<compile_context>
chip_gen: v7x
topology: tpu7x:2x2x1
jax: 0.10.0
libtpu: 0.0.40
codegen_flags: <defaults>
</compile_context>

<pallas_src>
import functools

import jax
import jax.numpy as jnp
from jax import lax
from jax.experimental import pallas as pl
from jax.experimental.pallas import tpu as pltpu

_HIGHEST = lax.Precision.HIGHEST


def _round_up(x, m):
    return ((x + m - 1) // m) * m


def _cdiv(a, b):
    return (a + b - 1) // b


def _balanced_block(length, max_block, min_blocks=1):
    """Pick a block size <= max_block (multiple of 8) that minimizes padding.

    e.g. length=300, max_block=512 -> block 152, padded 304 (not 512).
    min_blocks=2 lets the 'parallel' grid axis feed both v7x TensorCores.
    """
    n = max(_cdiv(length, max_block), min_blocks)
    n = min(n, max(_cdiv(length, 8), 1))
    b = _round_up(_cdiv(length, n), 8)
    n = _cdiv(length, b)
    return b, n * b


# ---------------------------------------------------------------------------
# Phase 1: merged K/V projection   k = key @ Wk^T + bk ; v = value @ Wv^T + bv
# ---------------------------------------------------------------------------
def _kv_proj_kernel(kx_ref, vx_ref, wk_ref, bk_ref, wv_ref, bv_ref,
                    ko_ref, vo_ref):
    ko_ref[...] = (jnp.dot(kx_ref[...], wk_ref[...],
                           preferred_element_type=jnp.float32,
                           precision=_HIGHEST) + bk_ref[...]).astype(ko_ref.dtype)
    vo_ref[...] = (jnp.dot(vx_ref[...], wv_ref[...],
                           preferred_element_type=jnp.float32,
                           precision=_HIGHEST) + bv_ref[...]).astype(vo_ref.dtype)


def _project_kv(k2d, v2d, wk_t, bk, wv_t, bv, *, block_m=512):
    """k2d/v2d: (M, D); w*_t: (D, Dp) (transposed + padded); b*: (1, Dp) f32."""
    M, D = k2d.shape
    Dp = wk_t.shape[1]
    bm, M_pad = _balanced_block(M, block_m, min_blocks=2)
    if M_pad != M:
        k2d = jnp.pad(k2d, ((0, M_pad - M), (0, 0)))
        v2d = jnp.pad(v2d, ((0, M_pad - M), (0, 0)))

    row_spec = pl.BlockSpec((bm, D), lambda i: (i, 0))
    # Constant index_map: weight/bias tiles are fetched once and stay resident
    # in VMEM across the whole row grid.
    # NOTE: for very large D (>= ~2K f32 on v7x) tile Dp or set vmem_limit_bytes.
    w_spec = pl.BlockSpec((D, Dp), lambda i: (0, 0))
    b_spec = pl.BlockSpec((1, Dp), lambda i: (0, 0))
    out_spec = pl.BlockSpec((bm, Dp), lambda i: (i, 0))

    kp, vp = pl.pallas_call(
        _kv_proj_kernel,
        out_shape=(jax.ShapeDtypeStruct((M_pad, Dp), k2d.dtype),
                   jax.ShapeDtypeStruct((M_pad, Dp), v2d.dtype)),
        grid_spec=pltpu.PrefetchScalarGridSpec(
            num_scalar_prefetch=0,
            grid=(M_pad // bm,),
            in_specs=[row_spec, row_spec, w_spec, b_spec, w_spec, b_spec],
            out_specs=[out_spec, out_spec],
        ),
        compiler_params=pltpu.CompilerParams(
            dimension_semantics=("parallel",)),
    )(k2d, v2d, wk_t, bk, wv_t, bv)
    if M_pad != M:
        kp, vp = kp[:M], vp[:M]
    return kp, vp


# ---------------------------------------------------------------------------
# Phase 2: flash attention with fused Q projection and online softmax
# ---------------------------------------------------------------------------
def _fused_attn_kernel(xq_ref, wq_ref, bq_ref, k_ref, v_ref, o_ref,
                       q_sc, m_sc, l_sc, acc_sc,
                       *, block_kv, kv_len, kv_len_padded):
    kv_i = pl.program_id(2)

    @pl.when(kv_i == 0)
    def _():
        # Fused Q projection: once per (batch, q-block).  xq/Wq/bq blocks are
        # grid-invariant along the kv axis, so they are not refetched per step.
        q_sc[...] = (jnp.dot(xq_ref[...], wq_ref[...],
                             preferred_element_type=jnp.float32,
                             precision=_HIGHEST) + bq_ref[...]).astype(q_sc.dtype)
        m_sc[...] = jnp.full_like(m_sc, -jnp.inf)
        l_sc[...] = jnp.zeros_like(l_sc)
        acc_sc[...] = jnp.zeros_like(acc_sc)

    k = k_ref[...]            # (bkv, Dp)
    v = v_ref[...]            # (bkv, Dp)

    # S = Q @ K^T : contract the last dims directly (no K transpose, no
    # transposed VMEM copy).  No 1/sqrt(D) scaling, matching the module.
    s = lax.dot_general(q_sc[...], k, (((1,), (1,)), ((), ())),
                        preferred_element_type=jnp.float32,
                        precision=_HIGHEST)                       # (bq, bkv)

    # Mask sequence-padded KV rows (branch only emitted when padding exists;
    # padded K rows carry the bias, so they must be masked out).
    if kv_len_padded != kv_len:
        pos = kv_i * block_kv + lax.broadcasted_iota(jnp.int32, s.shape, 1)
        s = jnp.where(pos < kv_len, s, -1e30)

    m_prev = m_sc[...]
    m_new = jnp.maximum(m_prev, jnp.max(s, axis=-1, keepdims=True))
    alpha = jnp.exp(m_prev - m_new)
    p = jnp.exp(s - m_new)

    l_sc[...] = alpha * l_sc[...] + jnp.sum(p, axis=-1, keepdims=True)
    acc_sc[...] = alpha * acc_sc[...] + jnp.dot(
        p.astype(v.dtype), v, preferred_element_type=jnp.float32,
        precision=_HIGHEST)
    m_sc[...] = m_new

    @pl.when(kv_i == pl.num_programs(2) - 1)
    def _():
        # Exact reciprocal/division: runs once per (b, q-block); negligible.
        o_ref[...] = (acc_sc[...] / l_sc[...]).astype(o_ref.dtype)


# ---------------------------------------------------------------------------
# Public wrapper
# ---------------------------------------------------------------------------
def cross_attention(query, key, value, params, *,
                    block_q=256, block_kv=512, block_m=512):
    """query: (B, Lq, D); key/value: (B, Lk, D). Returns (B, Lq, D)."""
    B, Lq, D = query.shape
    _, Lk, _ = key.shape
    dtype = query.dtype

    Dp = _round_up(D, 128)                         # lane-dense feature dim
    bq, Lq_p = _balanced_block(Lq, block_q, min_blocks=2 if B == 1 else 1)
    bkv, Lk_p = _balanced_block(Lk, block_kv)

    def pad_seq(x, L, L_p):
        return jnp.pad(x, ((0, 0), (0, L_p - L), (0, 0))) if L_p != L else x

    def prep_w(w):   # torch (out, in) -> (in, out); zero-pad output dim to Dp
        w_t = jnp.asarray(w).T.astype(dtype)
        return jnp.pad(w_t, ((0, 0), (0, Dp - D))) if Dp != D else w_t

    def prep_b(b):
        b2 = jnp.asarray(b).reshape(1, D).astype(jnp.float32)
        return jnp.pad(b2, ((0, 0), (0, Dp - D))) if Dp != D else b2

    # Phase 1: merged K/V projection with batch folded into the row dim.
    k2d = pad_seq(key, Lk, Lk_p).reshape(B * Lk_p, D)
    v2d = pad_seq(value, Lk, Lk_p).reshape(B * Lk_p, D)
    kp, vp = _project_kv(k2d, v2d,
                         prep_w(params["wk"]), prep_b(params["bk"]),
                         prep_w(params["wv"]), prep_b(params["bv"]),
                         block_m=block_m)
    kp = kp.reshape(B, Lk_p, Dp)
    vp = vp.reshape(B, Lk_p, Dp)

    # Phase 2: flash attention with the Q projection fused into the kernel.
    q_in = pad_seq(query, Lq, Lq_p)                               # (B, Lq_p, D)
    kernel = functools.partial(_fused_attn_kernel, block_kv=bkv,
                               kv_len=Lk, kv_len_padded=Lk_p)

    out = pl.pallas_call(
        kernel,
        out_shape=jax.ShapeDtypeStruct((B, Lq_p, Dp), dtype),
        grid_spec=pltpu.PrefetchScalarGridSpec(
            num_scalar_prefetch=0,
            grid=(B, Lq_p // bq, Lk_p // bkv),
            in_specs=[
                pl.BlockSpec((pl.Squeezed(), bq, D),
                             lambda b, qi, ki: (b, qi, 0)),       # query rows
                pl.BlockSpec((D, Dp), lambda b, qi, ki: (0, 0)),  # Wq resident
                pl.BlockSpec((1, Dp), lambda b, qi, ki: (0, 0)),  # bq resident
                pl.BlockSpec((pl.Squeezed(), bkv, Dp),
                             lambda b, qi, ki: (b, ki, 0)),       # K block
                pl.BlockSpec((pl.Squeezed(), bkv, Dp),
                             lambda b, qi, ki: (b, ki, 0)),       # V block
            ],
            out_specs=pl.BlockSpec((pl.Squeezed(), bq, Dp),
                                   lambda b, qi, ki: (b, qi, 0)),
            scratch_shapes=[
                pltpu.VMEM((bq, Dp), dtype),          # projected Q block
                pltpu.VMEM((bq, 1), jnp.float32),     # running max m
                pltpu.VMEM((bq, 1), jnp.float32),     # running denom l
                pltpu.VMEM((bq, Dp), jnp.float32),    # output accumulator
            ],
        ),
        # batch & q-block axes parallel (megacore / v7x 2-TC sharding),
        # kv axis is the online-softmax reduction -> arbitrary.
        compiler_params=pltpu.CompilerParams(
            dimension_semantics=("parallel", "parallel", "arbitrary")),
    )(q_in, prep_w(params["wq"]), prep_b(params["bq"]), kp, vp)

    return out[:, :Lq, :D]


# ---------------------------------------------------------------------------
# Pure-JAX reference (torch nn.Linear convention, full-f32 matmuls)
# ---------------------------------------------------------------------------
def _reference(query, key, value, params):
    hp = _HIGHEST
    q = jnp.einsum("bli,oi->blo", query, params["wq"], precision=hp) + params["bq"]
    k = jnp.einsum("bli,oi->blo", key, params["wk"], precision=hp) + params["bk"]
    v = jnp.einsum("bli,oi->blo", value, params["wv"], precision=hp) + params["bv"]
    s = jnp.einsum("bqd,bkd->bqk", q, k, precision=hp)
    p = jax.nn.softmax(s, axis=-1)
    return jnp.einsum("bqk,bkd->bqd", p, v, precision=hp)


def _make_params(key0, D):
    ks = jax.random.split(key0, 6)
    bound = 1.0 / jnp.sqrt(D)
    u = lambda k, shape: jax.random.uniform(k, shape, minval=-bound,
                                            maxval=bound, dtype=jnp.float32)
    return {"wq": u(ks[0], (D, D)), "bq": u(ks[1], (D,)),
            "wk": u(ks[2], (D, D)), "bk": u(ks[3], (D,)),
            "wv": u(ks[4], (D, D)), "bv": u(ks[5], (D,))}


if __name__ == "__main__":
    root = jax.random.PRNGKey(0)
    k_data, k_param, k_data2 = jax.random.split(root, 3)

    # Case 1: small shapes matching the module's typical usage.
    B, Lq, Lk, D = 2, 8, 8, 32
    kd = jax.random.split(k_data, 3)
    query = jax.random.normal(kd[0], (B, Lq, D), dtype=jnp.float32)
    key_t = jax.random.normal(kd[1], (B, Lk, D), dtype=jnp.float32)
    value = jax.random.normal(kd[2], (B, Lk, D), dtype=jnp.float32)
    params = _make_params(k_param, D)

    out = cross_attention(query, key_t, value, params)
    out = jax.block_until_ready(out)
    ref = _reference(query, key_t, value, params)
    assert out.shape == (B, Lq, D)
    assert jnp.allclose(out, ref, atol=1e-3, rtol=1e-3), "case1 mismatch vs reference"

    # Case 2: ragged lengths to exercise sequence padding + KV masking path.
    B2, Lq2, Lk2 = 2, 10, 12
    kd2 = jax.random.split(k_data2, 3)
    query2 = jax.random.normal(kd2[0], (B2, Lq2, D), dtype=jnp.float32)
    key2 = jax.random.normal(kd2[1], (B2, Lk2, D), dtype=jnp.float32)
    value2 = jax.random.normal(kd2[2], (B2, Lk2, D), dtype=jnp.float32)

    out2 = cross_attention(query2, key2, value2, params)
    out2 = jax.block_until_ready(out2)
    ref2 = _reference(query2, key2, value2, params)
    assert out2.shape == (B2, Lq2, D)
    assert jnp.allclose(out2, ref2, atol=1e-3, rtol=1e-3), "case2 mismatch vs reference"

    print("KERNEL_OK")
</pallas_src>

<mosaic_0001>
module attributes {stable_mosaic.version = 11 : i64} {
  func.func @_kv_proj_kernel(%arg0: i32, %arg1: memref<8x32xf32, #tpu.memory_space<vmem>>, %arg2: memref<8x32xf32, #tpu.memory_space<vmem>>, %arg3: memref<32x128xf32, #tpu.memory_space<vmem>>, %arg4: memref<1x128xf32, #tpu.memory_space<vmem>>, %arg5: memref<32x128xf32, #tpu.memory_space<vmem>>, %arg6: memref<1x128xf32, #tpu.memory_space<vmem>>, %arg7: memref<8x128xf32, #tpu.memory_space<vmem>>, %arg8: memref<8x128xf32, #tpu.memory_space<vmem>>) attributes {dimension_semantics = [#tpu.dimension_semantics<parallel>], iteration_bounds = array<i64: 2>, scalar_prefetch = 0 : i64, scratch_operands = 0 : i64, tpu.core_type = #tpu.core_type<tc>, window_params = [{transform_indices = @transform_0, window_bounds = array<i64: 8, 32>}, {transform_indices = @transform_1, window_bounds = array<i64: 8, 32>}, {pipeline_mode = #tpu.pipeline_mode<synchronous>, transform_indices = @transform_2, window_bounds = array<i64: 32, 128>}, {pipeline_mode = #tpu.pipeline_mode<synchronous>, transform_indices = @transform_3, window_bounds = array<i64: 1, 128>}, {pipeline_mode = #tpu.pipeline_mode<synchronous>, transform_indices = @transform_4, window_bounds = array<i64: 32, 128>}, {pipeline_mode = #tpu.pipeline_mode<synchronous>, transform_indices = @transform_5, window_bounds = array<i64: 1, 128>}, {transform_indices = @transform_6, window_bounds = array<i64: 8, 128>}, {transform_indices = @transform_7, window_bounds = array<i64: 8, 128>}]} {
    %c0 = arith.constant 0 : index
    %c0_0 = arith.constant 0 : index
    %0 = vector.load %arg1[%c0, %c0_0] : memref<8x32xf32, #tpu.memory_space<vmem>>, vector<8x32xf32>
    %c0_1 = arith.constant 0 : index
    %c0_2 = arith.constant 0 : index
    %1 = vector.load %arg3[%c0_1, %c0_2] : memref<32x128xf32, #tpu.memory_space<vmem>>, vector<32x128xf32>
    %cst = arith.constant dense<0.000000e+00> : vector<8x128xf32>
    %2 = tpu.matmul %0, %1, %cst {dimension_numbers = #tpu.dot_dimension_numbers<[1], [0], [0], [1], [0, 0, 1, 1], [], []>, precision = #tpu.contract_precision<fp32>} : vector<8x32xf32>, vector<32x128xf32>, vector<8x128xf32> -> vector<8x128xf32>
    %c0_3 = arith.constant 0 : index
    %c0_4 = arith.constant 0 : index
    %3 = vector.load %arg4[%c0_3, %c0_4] : memref<1x128xf32, #tpu.memory_space<vmem>>, vector<1x128xf32>
    %4 = vector.broadcast %3 : vector<1x128xf32> to vector<8x128xf32>
    %5 = arith.addf %2, %4 : vector<8x128xf32>
    %c0_5 = arith.constant 0 : index
    %c0_6 = arith.constant 0 : index
    %6 = vector.load %arg7[%c0_5, %c0_6] : memref<8x128xf32, #tpu.memory_space<vmem>>, vector<8x128xf32>
    tpu.vector_store %arg7[%c0_5, %c0_6], %5 {strides = array<i32>} : memref<8x128xf32, #tpu.memory_space<vmem>>, vector<8x128xf32>,
    %c0_7 = arith.constant 0 : index
    %c0_8 = arith.constant 0 : index
    %7 = vector.load %arg2[%c0_7, %c0_8] : memref<8x32xf32, #tpu.memory_space<vmem>>, vector<8x32xf32>
    %c0_9 = arith.constant 0 : index
    %c0_10 = arith.constant 0 : index
    %8 = vector.load %arg5[%c0_9, %c0_10] : memref<32x128xf32, #tpu.memory_space<vmem>>, vector<32x128xf32>
    %cst_11 = arith.constant dense<0.000000e+00> : vector<8x128xf32>
    %9 = tpu.matmul %7, %8, %cst_11 {dimension_numbers = #tpu.dot_dimension_numbers<[1], [0], [0], [1], [0, 0, 1, 1], [], []>, precision = #tpu.contract_precision<fp32>} : vector<8x32xf32>, vector<32x128xf32>, vector<8x128xf32> -> vector<8x128xf32>
    %c0_12 = arith.constant 0 : index
    %c0_13 = arith.constant 0 : index
    %10 = vector.load %arg6[%c0_12, %c0_13] : memref<1x128xf32, #tpu.memory_space<vmem>>, vector<1x128xf32>
    %11 = vector.broadcast %10 : vector<1x128xf32> to vector<8x128xf32>
    %12 = arith.addf %9, %11 : vector<8x128xf32>
    %c0_14 = arith.constant 0 : index
    %c0_15 = arith.constant 0 : index
    %13 = vector.load %arg8[%c0_14, %c0_15] : memref<8x128xf32, #tpu.memory_space<vmem>>, vector<8x128xf32>
    tpu.vector_store %arg8[%c0_14, %c0_15], %12 {strides = array<i32>} : memref<8x128xf32, #tpu.memory_space<vmem>>, vector<8x128xf32>,
    return
  }
  func.func @transform_0(%arg0: i32) -> (i32, i32) {
    %c0_i32 = arith.constant 0 : i32
    %c0_i32_0 = arith.constant 0 : i32
    return %arg0, %c0_i32 : i32, i32
  }
  func.func @transform_1(%arg0: i32) -> (i32, i32) {
    %c0_i32 = arith.constant 0 : i32
    %c0_i32_0 = arith.constant 0 : i32
    return %arg0, %c0_i32 : i32, i32
  }
  func.func @transform_2(%arg0: i32) -> (i32, i32) {
    %c0_i32 = arith.constant 0 : i32
    %c0_i32_0 = arith.constant 0 : i32
    %c0_i32_1 = arith.constant 0 : i32
    return %c0_i32, %c0_i32_0 : i32, i32
  }
  func.func @transform_3(%arg0: i32) -> (i32, i32) {
    %c0_i32 = arith.constant 0 : i32
    %c0_i32_0 = arith.constant 0 : i32
    %c0_i32_1 = arith.constant 0 : i32
    return %c0_i32, %c0_i32_0 : i32, i32
  }
  func.func @transform_4(%arg0: i32) -> (i32, i32) {
    %c0_i32 = arith.constant 0 : i32
    %c0_i32_0 = arith.constant 0 : i32
    %c0_i32_1 = arith.constant 0 : i32
    return %c0_i32, %c0_i32_0 : i32, i32
  }
  func.func @transform_5(%arg0: i32) -> (i32, i32) {
    %c0_i32 = arith.constant 0 : i32
    %c0_i32_0 = arith.constant 0 : i32
    %c0_i32_1 = arith.constant 0 : i32
    return %c0_i32, %c0_i32_0 : i32, i32
  }
  func.func @transform_6(%arg0: i32) -> (i32, i32) {
    %c0_i32 = arith.constant 0 : i32
    %c0_i32_0 = arith.constant 0 : i32
    return %arg0, %c0_i32 : i32, i32
  }
  func.func @transform_7(%arg0: i32) -> (i32, i32) {
    %c0_i32 = arith.constant 0 : i32
    %c0_i32_0 = arith.constant 0 : i32
    return %arg0, %c0_i32 : i32, i32
  }
}

</mosaic_0001>

<bundles_post_ra>
// kernel: tpu_custom_call.1
= control target key start
LH: loop header
LB: loop body
LE: loop exit
PB: predicated region body
PF: predicated region fallthrough
CT: control target
= control target key end

     0   :  { %s2703_s0 = inlined_call_operand.hbm [shape: f32[16,32], index: 0, kind: input, shape index: {}]   ;;  %s2704_s1 = inlined_call_operand.hbm [shape: f32[16,32], index: 1, kind: input, shape index: {}]   ;;  %s2705_s2 = inlined_call_operand.hbm [shape: f32[32,128], index: 2, kind: input, shape index: {}]   ;;  %s2706_s3 = inlined_call_operand.vmem [shape: f32[1,128], index: 3, kind: input, shape index: {}]   ;;  %s2707_s4 = inlined_call_operand.hbm [shape: f32[32,128], index: 4, kind: input, shape index: {}]   ;;  %s2708_s5 = inlined_call_operand.vmem [shape: f32[1,128], index: 5, kind: input, shape index: {}]   ;;  %s2709_s6 = inlined_call_operand.hbm [shape: f32[16,128], index: 6, kind: output, shape index: {0}]   ;;  %s2710_s7 = inlined_call_operand.hbm [shape: f32[16,128], index: 7, kind: output, shape index: {1}]  }
   0x1   :  { %2716 = sst [smem:[#allocation21_spill]] %s2705_s2 }
   0x2   :  { %2717 = sst [smem:[#allocation22_spill]] %s2707_s4 }
   0x3   :  { %13 = vsyncpa [#allocation3], 0 }
   0x4   :  { %15 = vsyncpa [#allocation3 + $0x1], 0 }
   0x5   :  { %16 = vsyncpa [#allocation6], 0 }
   0x6   :  { %18 = vsyncpa [#allocation6 + $0x1], 0 }
   0x7   :  { %19 = vsyncpa [#allocation9], 0 }
   0x8   :  { %20 = vsyncpa [#allocation4], 0 }
   0x9   :  { %22 = vsyncpa [#allocation4 + $0x1], 0 }
   0xa   :  { %23 = vsyncpa [#allocation12], 0 }
   0xb   :  { %25 = vsyncpa [#allocation12 + $0x1], 0  ;;  %s2221_s24 = smov 0   ;;  %s2223_s25 = smov 0  }
   0xc   :  { %s2225_s26 = smov 0   ;;  %s2227_s27 = smov 0  }
   0xd LB: > { %2718 = sst [smem:[#allocation19_spill]] %s2164_s26  ;;  %s2242_s28 = sadd.s32 4294967295, %s2168_s27   ;;  %s2168_s27 = sphi %s2227_s27, %s2742_s27   ;;  %s2164_s26 = sphi %s2225_s26, %s2739_s26   ;;  %s2160_s25 = sphi %s2223_s25, %s2741_s25   ;;  %s2156_s24 = sphi %s2221_s24, %s2740_s24  }
   0xe   : > { %s1550_s29 = sadd.s32 4294967294, %s2168_s27   ;;  %p51_p0 = scmp.ne.s32.totalorder %s2160_s25, %s2156_s24 }
   0xf   : > { %p2711_p1 = scmp.eq.s32.totalorder %s2242_s28, 0  ;;  %p191_p3 = scmp.eq.s32.totalorder %s1550_s29, 1 }
  0x10   : > { %p1551_p5 = scmp.ge.s32.totalorder %s2168_s27, 1  ;;  %p224_p7 = scmp.lt.s32.totalorder %s2168_s27, 3 }
  0x11   : > { %p2251_p4 = por %p2711_p1, %p51_p0  ;;  %p2256_p6 = por %p191_p3, %p51_p0 }
  0x12   : > { %p2261_p8 = pnand %p1551_p5, %p224_p7  ;;  %s2170_s10 = smov [#allocation7]  }
  0x13   : > { %s2719_s30 = scalar_select %p2251_p4, 1, 0 }
  0x14   : > { %s2720_s8 = scalar_select %p2256_p6, 1, 0 }
  0x15   : > { %s2721_s9 = scalar_select %p2261_p8, 1, 0 }
  0x16   : > { %s236_s11 = sshll.u32 %s2170_s10, 4  ;;  %p1876_p9 = pneg %p2261_p8  ;;  %s2265_s11 = int_to_ptr.vmem [resolvable:$true] %s236_s11 }
  0x17   : > { %s2171_s13 = smov [#allocation8]   ;;  %s2723_s2 = sld [smem:[#allocation21_spill]] }
  0x18   : > { %p2272_p11 = pnand %p1876_p9, %p2711_p1  ;;  %s252_s14 = sshll.u32 %s2171_s13, 4  ;;  %s2276_s14 = int_to_ptr.vmem [resolvable:$true] %s252_s14 }
  0x1a   : > { %p1944_p13 = pneg %p2272_p11 }
  0x1d   : > { %s1942_s17 = scalar_lea.hbm %s2723_s2, 512 }
  0x1e   : > { %p1943_p12 = scmp.ne.s32.totalorder %s2723_s2, %s1942_s17  ;;  %p1949_p5 = scmp.lt.u32.totalorder %s1942_s17, %s2723_s2 }
  0x20   : > { %p1945_p0 = pnand %p1944_p13, %p1943_p12 }
  0x22   : > { %p1946_p3 = pneg %p1945_p0 }
  0x24   : > { %p1951_p7 = pnand %p1949_p5, %p1946_p3 }
  0x26   : > { %1954 = shalt.err (!%p1951_p7)
}
  0x27   : > { %s1955_s22 = scalar_lea.vmem %s2265_s11, 512  ;;  %p1963_p2 = scmp.lt.s32.totalorder %s2265_s11, %s2265_s11 }
  0x28   : > { %p1956_p9 = scmp.ne.s32.totalorder %s2265_s11, %s1955_s22  ;;  %p1964_p12 = scmp.lt.s32.totalorder %s1955_s22, %s1955_s22 }
  0x2a   : > { %p1958_p10 = pnand %p1956_p9, %p1944_p13  ;;  %p1965_p0 = por %p1964_p12, %p1963_p2 }
  0x2c   : > { %p1959_p1 = pneg %p1958_p10 }
  0x2e   : > { %p1966_p6 = pnand %p1965_p0, %p1959_p1 }
  0x30   : > { %1969 = shalt.err (!%p1966_p6)
}
  0x31   : > { %s2172_s23 = smov 128   ;;  %s2173_s29 = smov 8  }
  0x32   : > { %1879 = dma.hbm_to_vmem [thread:$0]  (!%p2272_p11), %s2723_s2, 512, %s2265_s11, [#allocation6], %s2172_s23, %s2172_s23, %s2173_s29  }
  0x33   : > { %s2724_s4 = sld [smem:[#allocation22_spill]] }
  0x39   : > { %s1970_s17 = scalar_lea.hbm %s2724_s4, 512 }
  0x3a   : > { %p1971_p2 = scmp.ne.s32.totalorder %s2724_s4, %s1970_s17  ;;  %p1977_p10 = scmp.lt.u32.totalorder %s1970_s17, %s2724_s4 }
  0x3c   : > { %p1973_p1 = pnand %p1971_p2, %p1944_p13 }
  0x3e   : > { %p1974_p6 = pneg %p1973_p1 }
  0x40   : > { %p1979_p3 = pnand %p1977_p10, %p1974_p6 }
  0x42   : > { %1982 = shalt.err (!%p1979_p3)
}
  0x43   : > { %s1983_s11 = scalar_lea.vmem %s2276_s14, 512  ;;  %p1991_p12 = scmp.lt.s32.totalorder %s2276_s14, %s2276_s14 }
  0x44   : > { %p1984_p5 = scmp.ne.s32.totalorder %s2276_s14, %s1983_s11  ;;  %p1992_p0 = scmp.lt.s32.totalorder %s1983_s11, %s1983_s11 }
  0x46   : > { %p1986_p7 = pnand %p1984_p5, %p1944_p13  ;;  %p1993_p2 = por %p1992_p0, %p1991_p12 }
  0x48   : > { %p1987_p9 = pneg %p1986_p7 }
  0x4a   : > { %p1994_p1 = pnand %p1993_p2, %p1987_p9 }
  0x4c   : > { %1997 = shalt.err (!%p1994_p1)
}
  0x4d   : > { %1882 = dma.hbm_to_vmem [thread:$0]  (!%p2272_p11), %s2724_s4, 512, %s2276_s14, [#allocation9], %s2172_s23, %s2172_s23, %s2173_s29  }
  0x4e   : > { %s2331_s13 = sadd.s32 1, %s2168_s27   ;;  %s38_s12 = sadd.s32 1, %s2164_s26 }
  0x4f   : > { %s35_s15 = ssub.s32 %s2168_s27, %s2331_s13  ;;  %p45_p13 = scmp.ne.s32.totalorder %s2164_s26, %s2160_s25 }
  0x50   : > { %p36_p6 = scmp.eq.s32.totalorder %s35_s15, 0  ;;  %p46_p10 = scmp.eq.s32.totalorder %s2168_s27, 0 }
  0x51   : > { %p2725_p3 = scmp.eq.s32.totalorder %s2242_s28, 1  ;;  %p1899_p7 = scmp.lt.s32.totalorder %s2168_s27, 2 }
  0x52   : > { %s2347_s17 = scalar_select %p36_p6, %s2164_s26, %s38_s12  }
  0x53   : > { %p2341_p5 = por %p2725_p3, %p45_p13  ;;  %p47_p9 = por %p46_p10, %p45_p13 }
  0x54   : > { %2727 = sst [smem:[#allocation20_spill]] %s2347_s17  ;;  %s269_s18 = sand.u32 1, %s2164_s26  }
  0x55   : > { %s2726_s16 = scalar_select %p2341_p5, 1, 0 }
  0x56   : > { %s2350_s14 = sshll.u32 %s269_s18, 3  ;;  %s1556_s23 = sshll.u32 %s2168_s27, 7 }
  0x57   : > { %s2356_s20 = scalar_lea.hbm %s2703_s0, %s1556_s23  ;;  %s273_s21 = scalar_lea.vmem [#allocation2], %s2350_s14 }
  0x58   : > { %s280_s11 = sshll.u32 %s273_s21, 4  ;;  %p2361_p11 = pnand %p1899_p7, %p47_p9  ;;  %s2359_s11 = int_to_ptr.vmem [resolvable:$true] %s280_s11 }
  0x59   : > { %s2368_s15 = scalar_lea.hbm %s2704_s1, %s1556_s23  ;;  %s287_s29 = sand.u32 1, %s2168_s27  }
  0x5a   : > { %s270_s19 = scalar_lea.sflag [#allocation3], %s269_s18  ;;  %s1998_s2 = scalar_lea.hbm %s2356_s20, 128 }
  0x5b   : > { %p1999_p12 = scmp.ne.s32.totalorder %s2356_s20, %s1998_s2  ;;  %p2000_p0 = pneg %p2361_p11 }
  0x5c   : > { %s2003_s17 = scalar_lea.hbm %s2703_s0, 256  ;;  %p2004_p13 = scmp.lt.u32.totalorder %s2356_s20, %s2703_s0 }
  0x5d   : > { %p2001_p2 = pnand %p2000_p0, %p1999_p12  ;;  %p2005_p6 = scmp.lt.u32.totalorder %s2003_s17, %s1998_s2 }
  0x5e   : > { %p2007_p3 = scmp.lt.u32.totalorder %s1998_s2, %s2356_s20 }
  0x5f   : > { %p2002_p1 = pneg %p2001_p2  ;;  %p2006_p10 = por %p2005_p6, %p2004_p13 }
  0x61   : > { %p2008_p7 = por %p2007_p3, %p2006_p10 }
  0x63   : > { %p2009_p9 = pnand %p2008_p7, %p2002_p1 }
  0x65   : > { %2012 = shalt.err (!%p2009_p9)
}
  0x66   : > { %s2013_s18 = scalar_lea.vmem %s2359_s11, 128  ;;  %s2174_s4 = smov [#allocation2]  }
  0x67   : > { %p2014_p12 = scmp.ne.s32.totalorder %s2359_s11, %s2013_s18  ;;  %s2018_s23 = sshll.u32 %s2174_s4, 4  ;;  %s2019_s23 = int_to_ptr.vmem [resolvable:$false] %s2018_s23 }
  0x68   : > { %s2020_s26 = scalar_lea.vmem %s2019_s23, 256  ;;  %p2021_p4 = scmp.lt.s32.totalorder %s2359_s11, %s2019_s23 }
  0x69   : > { %p2016_p2 = pnand %p2014_p12, %p2000_p0  ;;  %p2022_p13 = scmp.lt.s32.totalorder %s2020_s26, %s2013_s18 }
  0x6b   : > { %p2017_p5 = pneg %p2016_p2  ;;  %p2023_p6 = por %p2022_p13, %p2021_p4 }
  0x6d   : > { %p2024_p10 = pnand %p2023_p6, %p2017_p5 }
  0x6f   : > { %2027 = shalt.err (!%p2024_p10)
}
  0x70   : > { %1886 = dma.hbm_to_vmem [thread:$0]  (!%p2361_p11), %s2356_s20, 128, %s2359_s11, %s270_s19  }
  0x71   : > { %s291_s2 = scalar_lea.vmem [#allocation5], %s2350_s14  ;;  %s288_s12 = scalar_lea.sflag [#allocation6], %s287_s29 }
  0x72   : > { %s298_s17 = sshll.u32 %s291_s2, 4  ;;  %s2028_s21 = scalar_lea.hbm %s2368_s15, 128  ;;  %s299_s17 = int_to_ptr.vmem [resolvable:$true] %s298_s17 }
  0x73   : > { %p2029_p4 = scmp.ne.s32.totalorder %s2368_s15, %s2028_s21  ;;  %s2033_s4 = scalar_lea.hbm %s2704_s1, 256 }
  0x74   : > { %p2034_p3 = scmp.lt.u32.totalorder %s2368_s15, %s2704_s1  ;;  %p2035_p7 = scmp.lt.u32.totalorder %s2033_s4, %s2028_s21 }
  0x75   : > { %p2031_p5 = pnand %p2029_p4, %p2000_p0  ;;  %p2037_p12 = scmp.lt.u32.totalorder %s2028_s21, %s2368_s15 }
  0x76   : > { %p2036_p9 = por %p2035_p7, %p2034_p3 }
  0x77   : > { %p2032_p1 = pneg %p2031_p5 }
  0x78   : > { %p2038_p2 = por %p2037_p12, %p2036_p9 }
  0x7a   : > { %p2039_p13 = pnand %p2038_p2, %p2032_p1 }
  0x7c   : > { %2042 = shalt.err (!%p2039_p13)
}
  0x7d   : > { %s2043_s14 = scalar_lea.vmem %s299_s17, 128  ;;  %s2175_s20 = smov [#allocation5]  }
  0x7e   : > { %p2044_p6 = scmp.ne.s32.totalorder %s299_s17, %s2043_s14  ;;  %s2048_s11 = sshll.u32 %s2175_s20, 4  ;;  %s2049_s11 = int_to_ptr.vmem [resolvable:$false] %s2048_s11 }
  0x7f   : > { %s2050_s29 = scalar_lea.vmem %s2049_s11, 256  ;;  %p2051_p5 = scmp.lt.s32.totalorder %s299_s17, %s2049_s11 }
  0x80   : > { %p2046_p10 = pnand %p2044_p6, %p2000_p0  ;;  %p2052_p8 = scmp.lt.s32.totalorder %s2050_s29, %s2043_s14 }
  0x82   : > { %p2047_p4 = pneg %p2046_p10  ;;  %p2053_p3 = por %p2052_p8, %p2051_p5 }
  0x84   : > { %p2054_p7 = pnand %p2053_p3, %p2047_p4 }
  0x86   : > { %2057 = shalt.err (!%p2054_p7)
}
  0x87   : > { %1889 = dma.hbm_to_vmem [thread:$0]  (!%p2361_p11), %s2368_s15, 128, %s299_s17, %s288_s12  }
  0x88   : > { %p2729_p1 = scmp.ne.s32.totalorder %s2721_s9, 0 }
  0x89   : > { %s2421_s19 = sand.u32 (!%p2729_p1), 1, %s2160_s25   ;;  %p2730_p8 = scmp.ne.s32.totalorder (!%p2729_p1), %s2719_s30, 0 }
  0x8a   : > { %307 = sbr.rel (%p2729_p1) target bundleno = 464 (0x1d0), region = 44  ;;  %s2424_s2 = sshll.u32 (!%p2729_p1), %s2421_s19, 3 }
  0x8b   : > { %s310_s21 = scalar_lea.sflag (!%p2729_p1), [#allocation3], %s2421_s19  ;;  %s313_s10 = scalar_lea.vmem (!%p2729_p1), [#allocation2], %s2424_s2 }
  0x91   : > { %2131 = dma.done.wait (%p2730_p8), %s310_s21, 128  }
  0x92   : > { %2133 = vsyncadd (%p2730_p8), %s310_s21, 4294967168  ;;  %s318_s9 = sand.u32 1, %s2242_s28   ;;  %s322_s15 = scalar_lea.vmem [#allocation5], %s2424_s2 }
  0x93   : > { %s319_s22 = scalar_lea.sflag [#allocation6], %s318_s9 }
  0x94   : > { %2135 = dma.done.wait (%p2730_p8), %s319_s22, 128  }
  0x95   : > { %2137 = vsyncadd (%p2730_p8), %s319_s22, 4294967168  ;;  %p2731_p11 = scmp.eq.s32.totalorder %s2242_s28, 0 }
  0x97   : > { %2139 = dma.done.wait (%p2731_p11), [#allocation6], 512   ;;  %p2732_p0 = pmov %p2731_p11 }
  0x99   : > { %2141 = vsyncadd (%p2732_p0), [#allocation6], 4294966784  ;;  %p2733_p9 = pmov %p2732_p0 }
  0x9a   : > { %p2734_p12 = pmov %p2732_p0 }
  0x9b   : > { %2143 = dma.done.wait (%p2733_p9), [#allocation9], 512  }
  0x9c   : > { %2145 = vsyncadd (%p2734_p12), [#allocation9], 4294966784  ;;  %v2176_v0 = vmov 0.0|0.0   ;;  %vm2177_vm0 = vmmov 0   ;;  %v2178_v1 = vmov 0.0   ;;  %v372_v2 = vld [vmem:[#allocation7] sm:$0xff] }
  0x9d   : > { %1766 = vmatprep.subr.bf16.mxu0 %v2176_v0  ;;  %1802 = vmatprep.subr.bf16.mxu1 %v2176_v0  ;;  %v373_v3 = vld [vmem:[#allocation7 + $0x8] sm:$0xff]  ;;  %v874_v4 = vld [vmem:[#allocation8] sm:$0xff]  ;;  %vm383_vm1 = vcmask 261120   ;;  %v388_v5 = vand.u32 4294901760, %v372_v2  ;;  %v374_v9 = vld [vmem:[#allocation7 + $0x10] sm:$0xff]  ;;  %s1570_s30 = sshll.u32 %s2242_s28, 7 }
  0x9e   : > { %1642 = vmatprep.mubr.msk.f32.mxu0 %vm2177_vm0, %v2178_v1  ;;  %1708 = vmatprep.mubr.msk.f32.mxu1 %vm2177_vm0, %v2178_v1  ;;  %v391_v6 = vand.u32 4294901760, %v373_v3  ;;  %v875_v7 = vld [vmem:[#allocation8 + $0x8] sm:$0xff]  ;;  %v889_v8 = vand.u32 4294901760, %v874_v4  ;;  %v375_v10 = vld [vmem:[#allocation7 + $0x18] sm:$0xff]  ;;  %v394_v12 = vand.u32 4294901760, %v374_v9  ;;  %v876_v14 = vld [vmem:[#allocation8 + $0x10] sm:$0xff]  ;;  %s2630_s21 = scalar_lea.hbm %s2709_s6, %s1570_s30 }
  0x9f   : > { %v892_v11 = vand.u32 4294901760, %v875_v7  ;;  %v397_v13 = vand.u32 4294901760, %v375_v10  ;;  %v877_v15 = vld [vmem:[#allocation8 + $0x18] sm:$0xff]  ;;  %v371_v16 = vld [vmem:[%s313_s10] sm:$0xff]  ;;  %v2456_v18 = vsub.f32 %v372_v2, %v388_v5  ;;  %v895_v27 = vand.u32 4294901760, %v876_v14  ;;  %s363_s18 = scalar_lea.vmem [#allocation10], %s2424_s2  ;;  %s2637_s10 = scalar_lea.hbm %s2710_s7, %s1570_s30 }
  0xa0   : > { %v2454_v17 = vpack.c.bf16 %v391_v6, %v388_v5  ;;  %v2458_v19 = vsub.f32 %v373_v3, %v391_v6  ;;  %v2460_v20 = vsub.f32 %v874_v4, %v889_v8  ;;  %v873_v21 = vld [vmem:[%s322_s15] sm:$0xff]  ;;  %v2470_v25 = vsub.f32 %v374_v9, %v394_v12  ;;  %s1393_s4 = sshll.u32 %s363_s18, 4  ;;  %s370_s14 = scalar_lea.vmem [#allocation11], %s2424_s2  ;;  %s2632_s4 = int_to_ptr.vmem [resolvable:$true] %s1393_s4 }
  0xa1   : > { %v2464_v22 = vpack.c.bf16 %v892_v11, %v889_v8  ;;  %v2466_v23 = vsub.f32 %v875_v7, %v892_v11  ;;  %v2468_v24 = vpack.c.bf16 %v397_v13, %v394_v12  ;;  %v2473_v26 = vsub.f32 %v375_v10, %v397_v13  ;;  %s1406_s20 = sshll.u32 %s370_s14, 4  ;;  %s1375_s9 = scalar_lea.sflag [#allocation4], %s2421_s19  ;;  %s2639_s20 = int_to_ptr.vmem [resolvable:$true] %s1406_s20 }
  0xa2   : > { %1768 = vmatpush3.bf16.msra.mxu0 %v2454_v17  ;;  %v898_v28 = vand.u32 4294901760, %v877_v15  ;;  %v385_v29 = vsel %vm383_vm1, %v371_v16, 0  ;;  %v886_v31 = vsel %vm383_vm1, %v873_v21, 0  ;;  %v469_v32 = vand.u32 4294901760, %v2456_v18  ;;  %s2058_s22 = scalar_lea.vmem %s2632_s4, 128  ;;  %p2735_p13 = scmp.ne.s32.totalorder %s2726_s16, 0 }
  0xa3   : > { %1804 = vmatpush3.bf16.msra.mxu1 %v2464_v22  ;;  %1769 = vmatprep.subr.bf16.mxu0 %v2176_v0  ;;  %v2478_v30 = vand.u32 4294901760, %v385_v29  ;;  %v476_v33 = vand.u32 4294901760, %v2458_v19  ;;  %v2486_v35 = vsub.f32 %v876_v14, %v895_v27  ;;  %v2490_v37 = vand.u32 4294901760, %v886_v31  ;;  %p2059_p2 = scmp.ne.s32.totalorder %s2632_s4, %s2058_s22  ;;  %s2179_s15 = smov [#allocation10]  }
  0xa4   : > { %1805 = vmatprep.subr.bf16.mxu1 %v2176_v0  ;;  %v2484_v34 = vpack.c.bf16 %v898_v28, %v895_v27  ;;  %v2488_v36 = vsub.f32 %v877_v15, %v898_v28  ;;  %v470_v39 = vsub.f32 %v2456_v18, %v469_v32  ;;  %v970_v41 = vand.u32 4294901760, %v2460_v20  ;;  %s2062_s17 = sshll.u32 %s2179_s15, 4  ;;  %s2063_s17 = int_to_ptr.vmem [resolvable:$false] %s2062_s17 }
  0xa5   : > { %v2493_v38 = vsub.f32 %v385_v29, %v2478_v30  ;;  %v477_v40 = vsub.f32 %v2458_v19, %v476_v33  ;;  %v2504_v42 = vsub.f32 %v886_v31, %v2490_v37  ;;  %v977_v43 = vand.u32 4294901760, %v2466_v23  ;;  %p2060_p6 = pnand %p2059_p2, %p2735_p13  ;;  %s2064_s12 = scalar_lea.vmem %s2063_s17, 256 }
  0xa6   : > { %1771 = vmatpush3.bf16.msra.mxu0 %v2468_v24  ;;  %v483_v44 = vand.u32 4294901760, %v2470_v25  ;;  %v490_v45 = vand.u32 4294901760, %v2473_v26  ;;  %v471_v47 = vand.u32 4294901760, %v470_v39  ;;  %v971_v49 = vsub.f32 %v2460_v20, %v970_v41  ;;  %p2065_p4 = scmp.lt.s32.totalorder %s2632_s4, %s2063_s17  ;;  %p2066_p5 = scmp.lt.s32.totalorder %s2064_s12, %s2058_s22 }
  0xa7   : > { %1807 = vmatpush3.bf16.msra.mxu1 %v2484_v34  ;;  %v458_v46 = vand.u32 4294901760, %v2493_v38  ;;  %1772 = vmatprep.subr.bf16.mxu0 %v2176_v0  ;;  %v478_v48 = vand.u32 4294901760, %v477_v40  ;;  %v959_v50 = vand.u32 4294901760, %v2504_v42  ;;  %v978_v51 = vsub.f32 %v2466_v23, %v977_v43  ;;  %p2061_p10 = pneg %p2060_p6 }
  0xa8   : > { %1808 = vmatprep.subr.bf16.mxu1 %v2176_v0  ;;  %v484_v52 = vsub.f32 %v2470_v25, %v483_v44  ;;  %v491_v53 = vsub.f32 %v2473_v26, %v490_v45  ;;  %v972_v56 = vand.u32 4294901760, %v971_v49  ;;  %v984_v57 = vand.u32 4294901760, %v2486_v35  ;;  %p2067_p3 = por %p2066_p5, %p2065_p4 }
  0xa9   : > { %v459_v54 = vsub.f32 %v2493_v38, %v458_v46  ;;  %v1773_v55 = vpack.c.bf16 %v478_v48, %v471_v47  ;;  %v960_v58 = vsub.f32 %v2504_v42, %v959_v50  ;;  %v979_v59 = vand.u32 4294901760, %v978_v51 }
  0xaa   : > { %v485_v60 = vand.u32 4294901760, %v484_v52  ;;  %v492_v61 = vand.u32 4294901760, %v491_v53  ;;  %v985_v63 = vsub.f32 %v2486_v35, %v984_v57  ;;  %v991_v2 = vand.u32 4294901760, %v2488_v36  ;;  %p2068_p7 = pnand %p2067_p3, %p2061_p10 }
  0xab   : > { %v460_v62 = vand.u32 4294901760, %v459_v54  ;;  %v961_v3 = vand.u32 4294901760, %v960_v58  ;;  %v1809_v4 = vpack.c.bf16 %v979_v59, %v972_v56  ;;  %v1779_v10 = vpack.c.bf16 %v2458_v19, %v2456_v18 }
  0xac   : > { %v986_v5 = vand.u32 4294901760, %v985_v63  ;;  %v992_v6 = vsub.f32 %v2488_v36, %v991_v2  ;;  %v1776_v7 = vpack.c.bf16 %v492_v61, %v485_v60  ;;  %v1815_v11 = vpack.c.bf16 %v2466_v23, %v2460_v20 }
  0xad   : > { %1643 = vmatmul.mubr.f32.vlgmr.msra.gmra.mrb[0].mxu0 %v460_v62  ;;  %1709 = vmatmul.mubr.f32.vlgmr.msra.gmra.mrb[0].mxu1 %v961_v3  ;;  %v1782_v12 = vpack.c.bf16 %v2473_v26, %v2470_v25  ;;  %v1818_v13 = vpack.c.bf16 %v2488_v36, %v2486_v35  ;;  %v1791_v14 = vpack.c.bf16 %v476_v33, %v469_v32 }
  0xae   : > { %1774 = vmatpush3.bf16.msra.mxu0 %v1773_v55  ;;  %1810 = vmatpush3.bf16.msra.mxu1 %v1809_v4  ;;  %v993_v8 = vand.u32 4294901760, %v992_v6  ;;  %v1827_v15 = vpack.c.bf16 %v977_v43, %v970_v41  ;;  %v1794_v16 = vpack.c.bf16 %v490_v45, %v483_v44  ;;  %v1830_v18 = vpack.c.bf16 %v991_v2, %v984_v57 }
  0xaf   : > { %1775 = vmatprep.subr.bf16.mxu0 %v2176_v0  ;;  %1811 = vmatprep.subr.bf16.mxu1 %v2176_v0 }
  0xb0   : > { %1653 = vmatprep.mubr.msk.f32.mxu0 %vm2177_vm0, %v2178_v1  ;;  %v1812_v9 = vpack.c.bf16 %v993_v8, %v986_v5  ;;  %1719 = vmatprep.mubr.msk.f32.mxu1 %vm2177_vm0, %v2178_v1 }
  0xb2   : > { %1777 = vmatpush3.bf16.msra.mxu0 %v1776_v7  ;;  %1813 = vmatpush3.bf16.msra.mxu1 %v1812_v9 }
  0xb3   : > { %1778 = vmatprep.subr.bf16.mxu0 %v2176_v0  ;;  %1814 = vmatprep.subr.bf16.mxu1 %v2176_v0 }
  0xb5   : > { %1654 = vmatmul.mubr.f32.vlgmr.msra.gmra.mrb[0].mxu0 %v2478_v30  ;;  %1720 = vmatmul.mubr.f32.vlgmr.msra.gmra.mrb[0].mxu1 %v2490_v37 }
  0xb6   : > { %1780 = vmatpush3.bf16.msra.mxu0 %v1779_v10  ;;  %1816 = vmatpush3.bf16.msra.mxu1 %v1815_v11 }
  0xb7   : > { %1781 = vmatprep.subr.bf16.mxu0 %v2176_v0  ;;  %1817 = vmatprep.subr.bf16.mxu1 %v2176_v0 }
  0xb8   : > { %1664 = vmatprep.mubr.msk.f32.mxu0 %vm2177_vm0, %v2178_v1  ;;  %1730 = vmatprep.mubr.msk.f32.mxu1 %vm2177_vm0, %v2178_v1 }
  0xba   : > { %1783 = vmatpush3.bf16.msra.mxu0 %v1782_v12  ;;  %1819 = vmatpush3.bf16.msra.mxu1 %v1818_v13 }
  0xbb   : > { %1784 = vmatprep.subr.bf16.mxu0 %v2176_v0  ;;  %1820 = vmatprep.subr.bf16.mxu1 %v2176_v0 }
  0xbd   : > { %1665 = vmatmul.mubr.f32.vlgmr.msra.gmra.mrb[0].mxu0 %v2493_v38  ;;  %1731 = vmatmul.mubr.f32.vlgmr.msra.gmra.mrb[0].mxu1 %v2504_v42 }
  0xbe   : > { %1786 = vmatpush3.bf16.msra.mxu0 %v2454_v17  ;;  %1822 = vmatpush3.bf16.msra.mxu1 %v2464_v22 }
  0xbf   : > { %1787 = vmatprep.subr.bf16.mxu0 %v2176_v0  ;;  %1823 = vmatprep.subr.bf16.mxu1 %v2176_v0 }
  0xc0   : > { %1675 = vmatprep.mubr.msk.f32.mxu0 %vm2177_vm0, %v2178_v1  ;;  %1741 = vmatprep.mubr.msk.f32.mxu1 %vm2177_vm0, %v2178_v1 }
  0xc2   : > { %1789 = vmatpush3.bf16.msra.mxu0 %v2468_v24  ;;  %1825 = vmatpush3.bf16.msra.mxu1 %v2484_v34 }
  0xc3   : > { %1790 = vmatprep.subr.bf16.mxu0 %v2176_v0  ;;  %1826 = vmatprep.subr.bf16.mxu1 %v2176_v0 }
  0xc5   : > { %1676 = vmatmul.mubr.f32.vlgmr.msra.gmra.mrb[0].mxu0 %v458_v46  ;;  %1742 = vmatmul.mubr.f32.vlgmr.msra.gmra.mrb[0].mxu1 %v959_v50 }
  0xc6   : > { %1792 = vmatpush3.bf16.msra.mxu0 %v1791_v14  ;;  %1828 = vmatpush3.bf16.msra.mxu1 %v1827_v15 }
  0xc7   : > { %1793 = vmatprep.subr.bf16.mxu0 %v2176_v0  ;;  %1829 = vmatprep.subr.bf16.mxu1 %v2176_v0 }
  0xc8   : > { %1686 = vmatprep.mubr.msk.f32.mxu0 %vm2177_vm0, %v2178_v1  ;;  %1752 = vmatprep.mubr.msk.f32.mxu1 %vm2177_vm0, %v2178_v1 }
  0xca   : > { %1795 = vmatpush3.bf16.msra.mxu0 %v1794_v16  ;;  %1831 = vmatpush3.bf16.msra.mxu1 %v1830_v18 }
  0xcb   : > { %1796 = vmatprep.subr.bf16.mxu0 %v2176_v0  ;;  %1832 = vmatprep.subr.bf16.mxu1 %v2176_v0 }
  0xcd   : > { %1687 = vmatmul.mubr.f32.vlgmr.msra.gmra.mrb[0].mxu0 %v2478_v30  ;;  %1753 = vmatmul.mubr.f32.vlgmr.msra.gmra.mrb[0].mxu1 %v2490_v37 }
  0xce   : > { %1798 = vmatpush3.bf16.msra.mxu0 %v2454_v17  ;;  %1834 = vmatpush3.bf16.msra.mxu1 %v2464_v22  ;;  %v1566_v17 = vld [vmem:[%s2706_s3] ss:$0 sm:$0xff] }
  0xcf   : > { %1799 = vmatprep.subr.bf16.mxu0 %v2176_v0  ;;  %1835 = vmatprep.subr.bf16.mxu1 %v2176_v0  ;;  %v1567_v0 = vld [vmem:[%s2708_s5] ss:$0 sm:$0xff] }
  0xd0   : > { %1697 = vmatprep.mubr.msk.f32.mxu0 %vm2177_vm0, %v2178_v1  ;;  %1763 = vmatprep.mubr.msk.f32.mxu1 %vm2177_vm0, %v2178_v1 }
  0xd2   : > { %1801 = vmatpush3.bf16.msra.mxu0 %v2468_v24  ;;  %1837 = vmatpush3.bf16.msra.mxu1 %v2484_v34 }
  0xd5   : > { %1698 = vmatmul.mubr.f32.vlgmr.msra.gmra.mrb[0].mxu0 %v2478_v30  ;;  %1764 = vmatmul.mubr.f32.vlgmr.msra.gmra.mrb[0].mxu1 %v2490_v37 }
 0x1a8   : > { %v868_v1 = vpop.f32.mrb[0].mxu0  ;;  %v1369_v20 = vpop.f32.mrb[0].mxu1 }
 0x1a9   : > { %v1838_v19 = vadd.f32 %v1566_v17, %v868_v1  ;;  %v1699_v21 = vpop.f32.mrb[1].mxu0  ;;  %v1839_v22 = vadd.f32 %v1567_v0, %v1369_v20  ;;  %v1765_v23 = vpop.f32.mrb[1].mxu1 }
 0x1ab   : > { %872 = vst [vmem:[%s363_s18] sm:$0xff] %v1838_v19  ;;  %1373 = vst [vmem:[%s370_s14] sm:$0xff] %v1839_v22 }
 0x1ac   : > { %2071 = shalt.err (!%p2068_p7)
}
 0x1ad   : > { %s2072_s30 = scalar_lea.hbm %s2630_s21, 128  ;;  %s2076_s26 = scalar_lea.hbm %s2709_s6, 256 }
 0x1ae   : > { %p2073_p1 = scmp.ne.s32.totalorder %s2630_s21, %s2072_s30  ;;  %p2077_p0 = scmp.lt.u32.totalorder %s2630_s21, %s2709_s6 }
 0x1af   : > { %p2078_p9 = scmp.lt.u32.totalorder %s2076_s26, %s2072_s30  ;;  %p2080_p2 = scmp.lt.u32.totalorder %s2072_s30, %s2630_s21 }
 0x1b0   : > { %p2074_p8 = pnand %p2073_p1, %p2735_p13 }
 0x1b1   : > { %p2079_p12 = por %p2078_p9, %p2077_p0 }
 0x1b2   : > { %p2075_p11 = pneg %p2074_p8 }
 0x1b3   : > { %p2081_p6 = por %p2080_p2, %p2079_p12 }
 0x1b5   : > { %p2082_p10 = pnand %p2081_p6, %p2075_p11 }
 0x1b7   : > { %2085 = shalt.err (!%p2082_p10)
}
 0x1b8   : > { %1872 = dma.vmem_to_hbm [thread:$0]  (%p2735_p13), %s2632_s4, 128, %s2630_s21, %s1375_s9  }
 0x1b9   : > { %s1380_s29 = scalar_lea.sflag [#allocation12], %s2421_s19  ;;  %s2086_s28 = scalar_lea.vmem %s2639_s20, 128 }
 0x1ba   : > { %p2087_p4 = scmp.ne.s32.totalorder %s2639_s20, %s2086_s28  ;;  %s2180_s2 = smov [#allocation11]  }
 0x1bb   : > { %s2090_s22 = sshll.u32 %s2180_s2, 4  ;;  %s2091_s22 = int_to_ptr.vmem [resolvable:$false] %s2090_s22 }
 0x1bc   : > { %p2088_p5 = pnand %p2087_p4, %p2735_p13  ;;  %s2092_s15 = scalar_lea.vmem %s2091_s22, 256 }
 0x1bd   : > { %p2093_p7 = scmp.lt.s32.totalorder %s2639_s20, %s2091_s22  ;;  %p2094_p1 = scmp.lt.s32.totalorder %s2092_s15, %s2086_s28 }
 0x1be   : > { %p2089_p3 = pneg %p2088_p5 }
 0x1bf   : > { %p2095_p8 = por %p2094_p1, %p2093_p7 }
 0x1c1   : > { %p2096_p11 = pnand %p2095_p8, %p2089_p3 }
 0x1c3   : > { %2099 = shalt.err (!%p2096_p11)
}
 0x1c4   : > { %s2100_s19 = scalar_lea.hbm %s2637_s10, 128  ;;  %s2104_s9 = scalar_lea.hbm %s2710_s7, 256 }
 0x1c5   : > { %p2101_p0 = scmp.ne.s32.totalorder %s2637_s10, %s2100_s19  ;;  %p2105_p2 = scmp.lt.u32.totalorder %s2637_s10, %s2710_s7 }
 0x1c6   : > { %p2106_p6 = scmp.lt.u32.totalorder %s2104_s9, %s2100_s19  ;;  %p2108_p4 = scmp.lt.u32.totalorder %s2100_s19, %s2637_s10 }
 0x1c7   : > { %p2102_p9 = pnand %p2101_p0, %p2735_p13 }
 0x1c8   : > { %p2107_p10 = por %p2106_p6, %p2105_p2 }
 0x1c9   : > { %p2103_p12 = pneg %p2102_p9 }
 0x1ca   : > { %p2109_p5 = por %p2108_p4, %p2107_p10 }
 0x1cc   : > { %p2110_p3 = pnand %p2109_p5, %p2103_p12 }
 0x1ce   : > { %2113 = shalt.err (!%p2110_p3)
}
 0x1cf   : > { %1873 = dma.vmem_to_hbm [thread:$0]  (%p2735_p13), %s2639_s20, 128, %s2637_s10, %s1380_s29  }
 0x1d0 PF: > { %s1418_s30 = sand.u32 1, %s2156_s24   ;;  %p2736_p7 = scmp.ne.s32.totalorder %s2720_s8, 0 }
 0x1d1   : > { %p2737_p1 = scmp.ge.s32.totalorder %s2168_s27, 2  ;;  %s1419_s18 = scalar_lea.sflag [#allocation4], %s1418_s30 }
 0x1d3   : > { %p1891_p8 = pnand %p2737_p1, %p2736_p7 }
 0x1d5   : > { %2147 = dma.done.wait (!%p1891_p8), %s1419_s18, 128  }
 0x1d6   : > { %2149 = vsyncadd (!%p1891_p8), %s1419_s18, 4294967168  ;;  %s1428_s23 = scalar_lea.sflag [#allocation12], %s1418_s30 }
 0x1d7   : > { %2151 = dma.done.wait (!%p1891_p8), %s1428_s23, 128  }
 0x1d8   : > { %2153 = vsyncadd (!%p1891_p8), %s1428_s23, 4294967168  ;;  %s2738_s16 = sld [smem:[#allocation19_spill]]  ;;  %s2739_s26 = sld [smem:[#allocation20_spill]] }
 0x1d9   : > { %p28_p13 = scmp.ge.s32.totalorder %s2331_s13, 4   ;;  %s2740_s24 = smov %s2160_s25 }
 0x1da   : > { %s2742_s27 = smov %s2331_s13 }
 0x1db   :  { %30 = sbr.rel (!%p28_p13) target bundleno = 13 (0xd), region = 127 }
 0x1de   : > { %s2741_s25 = smov %s2738_s16 }
 0x1e2   :  { %1433 = vsyncpa [#allocation3], 1 }
 0x1e3   :  { %1435 = vsyncpa [#allocation3 + $0x1], 1 }
 0x1e4   :  { %1436 = vsyncpa [#allocation6], 1 }
 0x1e5   :  { %1438 = vsyncpa [#allocation6 + $0x1], 1 }
 0x1e6   :  { %1439 = vsyncpa [#allocation9], 1 }
 0x1e7   :  { %1440 = vsyncpa [#allocation4], 1 }
 0x1e8   :  { %1442 = vsyncpa [#allocation4 + $0x1], 1 }
 0x1e9   :  { %1443 = vsyncpa [#allocation12], 1 }
 0x1ea   :  { %1445 = vsyncpa [#allocation12 + $0x1], 1 }

</bundles_post_ra>
